<compile_context>
chip_gen: v7x
topology: tpu7x:2x2x1
jax: 0.10.0
libtpu: 0.0.40
codegen_flags: <defaults>
</compile_context>

<pallas_src>
import functools

import jax
import jax.numpy as jnp
from jax.experimental import pallas as pl
from jax.experimental.pallas import tpu as pltpu


# --------------------------------------------------------------------------------------
# Kernel body
# --------------------------------------------------------------------------------------
def _rotary_kernel(cos_ref, sin_ref, q_ref, k_ref, q_out_ref, k_out_ref, *,
                   half, rotary_dim, head_size, shift_lo, shift_hi):
    """One token block:  out = x * cos_p + partner(x) * sin_s  (sign folded into sin_s).

    partner[j] = x[j + half]        for j <  half
               = x[j - half]        for half <= j < rotary_dim
               = don't-care         for j >= rotary_dim   (sin_s == 0 there)
    Built with XLU lane rotates (pltpu.roll) so no lane-slice/concat temporaries.
    """
    cos = cos_ref[...][:, None, :]   # (T, 1, D) f32; 1.0 on pass-through lanes
    sin = sin_ref[...][:, None, :]   # (T, 1, D) f32; sign-folded, 0.0 on pass-through lanes

    if rotary_dim != head_size:
        lane = jax.lax.broadcasted_iota(jnp.int32, (1, 1, head_size), 2)
        lo_mask = lane < half        # hoisted once, shared by q and k
    else:
        lo_mask = None

    def apply(x_ref, o_ref):         # x: (T, H, D)
        x = x_ref[...]
        if rotary_dim == head_size:
            # Circular swap of the two halves; rotation by head_size//2 is
            # direction-agnostic.
            partner = pltpu.roll(x, half, 2)
        else:
            partner = jnp.where(lo_mask,
                                pltpu.roll(x, shift_lo, 2),
                                pltpu.roll(x, shift_hi, 2))
        o_ref[...] = (x.astype(jnp.float32) * cos
                      + partner.astype(jnp.float32) * sin).astype(o_ref.dtype)

    apply(q_ref, q_out_ref)
    apply(k_ref, k_out_ref)


# --------------------------------------------------------------------------------------
# Helpers
# --------------------------------------------------------------------------------------
def make_cos_sin_cache(rotary_dim, max_position_embeddings=2048, base=10000):
    inv_freq = 1.0 / (base ** (jnp.arange(0, rotary_dim, 2, dtype=jnp.float32) / rotary_dim))
    t = jnp.arange(max_position_embeddings, dtype=jnp.float32)
    freqs = jnp.einsum("i,j->ij", t, inv_freq)               # (max_pos, rd/2)
    emb = jnp.concatenate([freqs, freqs], axis=-1)           # (max_pos, rd)
    return jnp.cos(emb), jnp.sin(emb)


@functools.lru_cache(maxsize=None)
def _roll_is_np_semantics() -> bool:
    """One-time lane-rotate direction check: True if pltpu.roll matches np.roll
    (out[i] = x[(i - shift) % n]).  Only consulted for partial rotary; the full-rotary
    path is direction-agnostic.  Tiny (8,128) kernel, runs at most once per process."""
    def k(x_ref, o_ref):
        o_ref[...] = pltpu.roll(x_ref[...], 1, 1)
    x = jnp.tile(jnp.arange(128, dtype=jnp.float32)[None, :], (8, 1))
    out = pl.pallas_call(k, out_shape=jax.ShapeDtypeStruct((8, 128), jnp.float32))(x)
    return bool(jax.device_get(out)[0, 0] >= 64.0)   # np.roll: out[0] = x[-1] = 127


@functools.lru_cache(maxsize=None)
def _vmem_limits():
    """(vmem_limit_bytes, tile_budget_bytes) chosen per chip generation."""
    phys = 0
    try:
        info = pltpu.get_tpu_info()
        phys = getattr(info, "vmem_capacity_bytes", 0) or getattr(info, "vmem_bytes", 0) or 0
    except Exception:
        phys = 0
    if phys >= 128 * 1024 * 1024:           # v5e / v6e: 128 MiB physical VMEM
        return 96 * 1024 * 1024, 40 * 1024 * 1024
    # v7x (64 MiB per TensorCore) or unknown -> conservative
    return 44 * 1024 * 1024, 18 * 1024 * 1024


# --------------------------------------------------------------------------------------
# Wrapper
# --------------------------------------------------------------------------------------
def rotary_embedding_neox(positions, query, key, cos_cached, sin_cached, rotary_dim,
                          *, t_block=None):
    """positions: (T,) int32, query: (T, H, D), key: (T, KH, D) -> (q_out, k_out).

    Outputs alias the inputs (in-place semantics); do not reuse query/key afterwards.
    """
    T, H, D = query.shape
    KH = key.shape[1]
    half = rotary_dim // 2

    # --- per-token f32 tables (tiny glue vs. q/k streaming): gather, sign-fold, pad ---
    cos_g = jnp.take(cos_cached, positions, axis=0).astype(jnp.float32)   # (T, rd)
    sin_g = jnp.take(sin_cached, positions, axis=0).astype(jnp.float32)   # (T, rd)
    sin_f = jnp.concatenate([-sin_g[:, :half], sin_g[:, half:]], axis=-1)  # sign-folded
    if rotary_dim < D:
        pad_w = D - rotary_dim
        cos_p = jnp.concatenate([cos_g, jnp.ones((T, pad_w), jnp.float32)], axis=-1)
        sin_s = jnp.concatenate([sin_f, jnp.zeros((T, pad_w), jnp.float32)], axis=-1)
    else:
        cos_p, sin_s = cos_g, sin_f

    # --- roll shift assignment (partial rotary only; see _roll_is_np_semantics) ---
    if rotary_dim == D:
        shift_lo = shift_hi = half
    elif _roll_is_np_semantics():
        shift_lo, shift_hi = D - half, half
    else:
        shift_lo, shift_hi = half, D - half

    # --- token tile sized against a double-buffered VMEM budget ---
    vmem_limit, tile_budget = _vmem_limits()
    q_item = jnp.dtype(query.dtype).itemsize
    k_item = jnp.dtype(key.dtype).itemsize
    bytes_per_token = (H * q_item + KH * k_item) * D * 2 + 2 * D * 4   # q/k in+out + cos+sin
    if t_block is None:
        t_block = tile_budget // (2 * bytes_per_token)
        t_block = max(8, min(1024, int(t_block)))
        if T >= 8 * 128:                      # keep >= ~8 grid steps so both v7x TCs stream
            t_block = min(t_block, T // 8)
    if t_block >= T:
        t_block = T                           # single full-extent block (always legal)
    else:
        t_block = max(8, (int(t_block) // 8) * 8)   # sublane-aligned (2-D cos/sin blocks)

    grid = (pl.cdiv(T, t_block),)             # ragged last block handled by Pallas masking
    kernel = functools.partial(_rotary_kernel, half=half, rotary_dim=rotary_dim,
                               head_size=D, shift_lo=shift_lo, shift_hi=shift_hi)

    q_out, k_out = pl.pallas_call(
        kernel,
        out_shape=(
            jax.ShapeDtypeStruct((T, H, D), query.dtype),
            jax.ShapeDtypeStruct((T, KH, D), key.dtype),
        ),
        grid_spec=pltpu.PrefetchScalarGridSpec(
            num_scalar_prefetch=0,
            grid=grid,
            in_specs=[
                pl.BlockSpec((t_block, D), lambda i: (i, 0)),
                pl.BlockSpec((t_block, D), lambda i: (i, 0)),
                pl.BlockSpec((t_block, H, D), lambda i: (i, 0, 0)),
                pl.BlockSpec((t_block, KH, D), lambda i: (i, 0, 0)),
            ],
            out_specs=[
                pl.BlockSpec((t_block, H, D), lambda i: (i, 0, 0)),
                pl.BlockSpec((t_block, KH, D), lambda i: (i, 0, 0)),
            ],
        ),
        # In-place (vLLM-style): query -> q_out, key -> k_out on the ORIGINAL buffers.
        input_output_aliases={2: 0, 3: 1},
        compiler_params=pltpu.CompilerParams(
            dimension_semantics=("parallel",),
            vmem_limit_bytes=vmem_limit,
        ),
    )(cos_p, sin_s, query, key)

    return q_out, k_out


# --------------------------------------------------------------------------------------
# Pure-JAX reference (mirrors the PyTorch module) + self-test
# --------------------------------------------------------------------------------------
def _reference(positions, query, key, cos_cached, sin_cached, rotary_dim):
    cos = jnp.take(cos_cached, positions, axis=0)[:, None, :]
    sin = jnp.take(sin_cached, positions, axis=0)[:, None, :]

    def apply(x):
        x_rot = x[..., :rotary_dim]
        x_pass = x[..., rotary_dim:]
        half = rotary_dim // 2
        rot = jnp.concatenate([-x_rot[..., half:], x_rot[..., :half]], axis=-1)
        x_emb = x_rot * cos + rot * sin
        return jnp.concatenate([x_emb, x_pass], axis=-1)

    return apply(query), apply(key)


if __name__ == "__main__":
    max_pos = 2048
    root = jax.random.PRNGKey(0)

    configs = [
        # (T, H, KH, D, rotary_dim, t_block): full rotary + multi-step ragged grid,
        # then partial rotary + single full-extent block.
        dict(T=20, H=8, KH=8, D=128, rd=128, t_block=8),
        dict(T=8, H=4, KH=4, D=128, rd=64, t_block=None),
    ]

    for idx, cfg in enumerate(configs):
        k1, k2, k3 = jax.random.split(jax.random.fold_in(root, idx), 3)
        positions = jax.random.randint(k1, (cfg["T"],), 0, max_pos, dtype=jnp.int32)
        query = jax.random.normal(k2, (cfg["T"], cfg["H"], cfg["D"]), dtype=jnp.float32)
        key_t = jax.random.normal(k3, (cfg["T"], cfg["KH"], cfg["D"]), dtype=jnp.float32)
        cos_cached, sin_cached = make_cos_sin_cache(cfg["rd"], max_pos)

        # Reference first: kernel outputs alias (donate) the input buffers.
        q_ref, k_ref = _reference(positions, query, key_t, cos_cached, sin_cached, cfg["rd"])
        jax.block_until_ready((q_ref, k_ref))

        q_out, k_out = rotary_embedding_neox(
            positions, query, key_t, cos_cached, sin_cached, cfg["rd"],
            t_block=cfg["t_block"],
        )
        jax.block_until_ready((q_out, k_out))

        assert jnp.allclose(q_out, q_ref, atol=1e-5, rtol=1e-5), f"q mismatch (config {idx})"
        assert jnp.allclose(k_out, k_ref, atol=1e-5, rtol=1e-5), f"k mismatch (config {idx})"

    print("KERNEL_OK")
</pallas_src>

<mosaic_0001>
module attributes {stable_mosaic.version = 11 : i64} {
  func.func @_rotary_kernel(%arg0: i32, %arg1: memref<8x128xf32, #tpu.memory_space<vmem>>, %arg2: memref<8x128xf32, #tpu.memory_space<vmem>>, %arg3: memref<8x8x128xf32, #tpu.memory_space<vmem>>, %arg4: memref<8x8x128xf32, #tpu.memory_space<vmem>>, %arg5: memref<8x8x128xf32, #tpu.memory_space<vmem>>, %arg6: memref<8x8x128xf32, #tpu.memory_space<vmem>>) attributes {dimension_semantics = [#tpu.dimension_semantics<parallel>], iteration_bounds = array<i64: 3>, scalar_prefetch = 0 : i64, scratch_operands = 0 : i64, tpu.core_type = #tpu.core_type<tc>, window_params = [{transform_indices = @transform_0, window_bounds = array<i64: 8, 128>}, {transform_indices = @transform_1, window_bounds = array<i64: 8, 128>}, {transform_indices = @transform_2, window_bounds = array<i64: 8, 8, 128>}, {transform_indices = @transform_3, window_bounds = array<i64: 8, 8, 128>}, {transform_indices = @transform_4, window_bounds = array<i64: 8, 8, 128>}, {transform_indices = @transform_5, window_bounds = array<i64: 8, 8, 128>}]} {
    %c0 = arith.constant 0 : index
    %c0_0 = arith.constant 0 : index
    %0 = vector.load %arg1[%c0, %c0_0] : memref<8x128xf32, #tpu.memory_space<vmem>>, vector<8x128xf32>
    %1 = vector.shape_cast %0 : vector<8x128xf32> to vector<8x1x128xf32>
    %c0_1 = arith.constant 0 : index
    %c0_2 = arith.constant 0 : index
    %2 = vector.load %arg2[%c0_1, %c0_2] : memref<8x128xf32, #tpu.memory_space<vmem>>, vector<8x128xf32>
    %3 = vector.shape_cast %2 : vector<8x128xf32> to vector<8x1x128xf32>
    %c0_3 = arith.constant 0 : index
    %c0_4 = arith.constant 0 : index
    %c0_5 = arith.constant 0 : index
    %4 = vector.load %arg3[%c0_3, %c0_4, %c0_5] : memref<8x8x128xf32, #tpu.memory_space<vmem>>, vector<8x8x128xf32>
    %c64_i32 = arith.constant 64 : i32
    %5 = tpu.dynamic_rotate %4 by %c64_i32 dim 2 : vector<8x8x128xf32>, i32 -> vector<8x8x128xf32>
    %6 = vector.broadcast %1 : vector<8x1x128xf32> to vector<8x8x128xf32>
    %7 = arith.mulf %4, %6 : vector<8x8x128xf32>
    %8 = vector.broadcast %3 : vector<8x1x128xf32> to vector<8x8x128xf32>
    %9 = arith.mulf %5, %8 : vector<8x8x128xf32>
    %10 = arith.addf %7, %9 : vector<8x8x128xf32>
    %c0_6 = arith.constant 0 : index
    %c0_7 = arith.constant 0 : index
    %c0_8 = arith.constant 0 : index
    %11 = vector.load %arg5[%c0_6, %c0_7, %c0_8] : memref<8x8x128xf32, #tpu.memory_space<vmem>>, vector<8x8x128xf32>
    tpu.vector_store %arg5[%c0_6, %c0_7, %c0_8], %10 {strides = array<i32>} : memref<8x8x128xf32, #tpu.memory_space<vmem>>, vector<8x8x128xf32>,
    %c0_9 = arith.constant 0 : index
    %c0_10 = arith.constant 0 : index
    %c0_11 = arith.constant 0 : index
    %12 = vector.load %arg4[%c0_9, %c0_10, %c0_11] : memref<8x8x128xf32, #tpu.memory_space<vmem>>, vector<8x8x128xf32>
    %c64_i32_12 = arith.constant 64 : i32
    %13 = tpu.dynamic_rotate %12 by %c64_i32_12 dim 2 : vector<8x8x128xf32>, i32 -> vector<8x8x128xf32>
    %14 = vector.broadcast %1 : vector<8x1x128xf32> to vector<8x8x128xf32>
    %15 = arith.mulf %12, %14 : vector<8x8x128xf32>
    %16 = vector.broadcast %3 : vector<8x1x128xf32> to vector<8x8x128xf32>
    %17 = arith.mulf %13, %16 : vector<8x8x128xf32>
    %18 = arith.addf %15, %17 : vector<8x8x128xf32>
    %c0_13 = arith.constant 0 : index
    %c0_14 = arith.constant 0 : index
    %c0_15 = arith.constant 0 : index
    %19 = vector.load %arg6[%c0_13, %c0_14, %c0_15] : memref<8x8x128xf32, #tpu.memory_space<vmem>>, vector<8x8x128xf32>
    tpu.vector_store %arg6[%c0_13, %c0_14, %c0_15], %18 {strides = array<i32>} : memref<8x8x128xf32, #tpu.memory_space<vmem>>, vector<8x8x128xf32>,
    return
  }
  func.func @transform_0(%arg0: i32) -> (i32, i32) {
    %c0_i32 = arith.constant 0 : i32
    %c0_i32_0 = arith.constant 0 : i32
    return %arg0, %c0_i32 : i32, i32
  }
  func.func @transform_1(%arg0: i32) -> (i32, i32) {
    %c0_i32 = arith.constant 0 : i32
    %c0_i32_0 = arith.constant 0 : i32
    return %arg0, %c0_i32 : i32, i32
  }
  func.func @transform_2(%arg0: i32) -> (i32, i32, i32) {
    %c0_i32 = arith.constant 0 : i32
    %c0_i32_0 = arith.constant 0 : i32
    %c0_i32_1 = arith.constant 0 : i32
    return %arg0, %c0_i32, %c0_i32_0 : i32, i32, i32
  }
  func.func @transform_3(%arg0: i32) -> (i32, i32, i32) {
    %c0_i32 = arith.constant 0 : i32
    %c0_i32_0 = arith.constant 0 : i32
    %c0_i32_1 = arith.constant 0 : i32
    return %arg0, %c0_i32, %c0_i32_0 : i32, i32, i32
  }
  func.func @transform_4(%arg0: i32) -> (i32, i32, i32) {
    %c0_i32 = arith.constant 0 : i32
    %c0_i32_0 = arith.constant 0 : i32
    %c0_i32_1 = arith.constant 0 : i32
    return %arg0, %c0_i32, %c0_i32_0 : i32, i32, i32
  }
  func.func @transform_5(%arg0: i32) -> (i32, i32, i32) {
    %c0_i32 = arith.constant 0 : i32
    %c0_i32_0 = arith.constant 0 : i32
    %c0_i32_1 = arith.constant 0 : i32
    return %arg0, %c0_i32, %c0_i32_0 : i32, i32, i32
  }
}

</mosaic_0001>

<bundles_post_ra>
// kernel: tpu_custom_call.1
= control target key start
LH: loop header
LB: loop body
LE: loop exit
PB: predicated region body
PF: predicated region fallthrough
CT: control target
= control target key end

     0   :  { %11 = vsyncpa [#allocation3], 0  ;;  %s1565_s0 = inlined_call_operand.vmem [shape: f32[20,128], index: 0, kind: input, shape index: {}]   ;;  %s1566_s1 = inlined_call_operand.vmem [shape: f32[20,128], index: 1, kind: input, shape index: {}]   ;;  %s1567_s2 = inlined_call_operand.hbm [shape: f32[20,8,128], index: 2, kind: input, shape index: {}, may-alias: {2,4}]   ;;  %s1568_s3 = inlined_call_operand.hbm [shape: f32[20,8,128], index: 3, kind: input, shape index: {}, may-alias: {3,5}]   ;;  %s1569_s4 = inlined_call_operand.hbm [shape: f32[20,8,128], index: 4, kind: output, shape index: {0}, may-alias: {2,4}]   ;;  %s1570_s5 = inlined_call_operand.hbm [shape: f32[20,8,128], index: 5, kind: output, shape index: {1}, may-alias: {3,5}]  }
   0x1   :  { %13 = vsyncpa [#allocation3 + $0x1], 0 }
   0x2   :  { %14 = vsyncpa [#allocation6], 0 }
   0x3   :  { %16 = vsyncpa [#allocation6 + $0x1], 0 }
   0x4   :  { %17 = vsyncpa [#allocation4], 0 }
   0x5   :  { %19 = vsyncpa [#allocation4 + $0x1], 0 }
   0x6   :  { %20 = vsyncpa [#allocation9], 0 }
   0x7   :  { %22 = vsyncpa [#allocation9 + $0x1], 0  ;;  %s1157_s18 = smov 0   ;;  %s1159_s19 = smov 0  }
   0x8   :  { %s1161_s20 = smov 0   ;;  %s1163_s21 = smov 0  }
   0x9 LB: > { %s1178_s22 = sadd.s32 4294967295, %s1111_s21   ;;  %s853_s23 = sadd.s32 4294967294, %s1111_s21   ;;  %s1111_s21 = sphi %s1163_s21, %s1581_s21   ;;  %s1107_s20 = sphi %s1161_s20, %s1580_s20   ;;  %s1103_s19 = sphi %s1159_s19, %s1579_s19   ;;  %s1099_s18 = sphi %s1157_s18, %s1578_s18  }
   0xa   : > { %s1182_s24 = sadd.s32 1, %s1111_s21   ;;  %s87_s25 = sadd.s32 1, %s1107_s20 }
   0xb   : > { %s84_s26 = ssub.s32 %s1111_s21, %s1182_s24  ;;  %p94_p0 = scmp.ne.s32.totalorder %s1107_s20, %s1103_s19 }
   0xc   : > { %p85_p1 = scmp.eq.s32.totalorder %s84_s26, 0  ;;  %p95_p2 = scmp.eq.s32.totalorder %s1111_s21, 0 }
   0xd   : > { %p100_p3 = scmp.ne.s32.totalorder %s1103_s19, %s1099_s18  ;;  %p101_p4 = scmp.eq.s32.totalorder %s1178_s22, 0 }
   0xe   : > { %s1194_s27 = scalar_select %p85_p1, %s1107_s20, %s87_s25  }
   0xf   : > { %p1196_p5 = por %p95_p2, %p94_p0  ;;  %p1200_p6 = por %p101_p4, %p100_p3 }
  0x10   : > { %p150_p7 = scmp.eq.s32.totalorder %s1178_s22, 2  ;;  %p156_p8 = scmp.eq.s32.totalorder %s853_s23, 2 }
  0x11   : > { %p855_p11 = scmp.ge.s32.totalorder %s1111_s21, 3 }
  0x12   : > { %p1205_p9 = por %p150_p7, %p94_p0  ;;  %p1209_p10 = por %p156_p8, %p100_p3 }
  0x13   : > { %198 = sbr.rel (%p855_p11) target bundleno = 96 (0x60), region = 16 }
  0x14   : > { %s1573_s30 = scalar_select %p1205_p9, 1, 0 }
  0x15   : > { %s1574_s6 = scalar_select %p1209_p10, 1, 0 }
  0x1a   : > { %215 = sbr.rel (!%p1196_p5) target bundleno = 61 (0x3d), region = 28  ;;  %s216_s7 = sand.u32 (%p1196_p5), 1, %s1107_s20  }
  0x1b   : > { %s857_s8 = sshll.u32 (%p1196_p5), %s1111_s21, 3  ;;  %s856_s9 = sshll.u32 (%p1196_p5), %s216_s7, 6 }
  0x1c   : > { %s222_s10 = ssub.s32 (%p1196_p5), 20, %s857_s8  ;;  %s1221_s13 = scalar_lea.sflag (%p1196_p5), [#allocation3], %s216_s7 }
  0x1d   : > { %p223_p12 = scmp.lt.s32.totalorder (%p1196_p5), %s222_s10, 8  ;;  %s220_s14 = scalar_lea.vmem (%p1196_p5), [#allocation2], %s856_s9 }
  0x21   : > { %s1583_s10 = smov (!%p223_p12, %s222_s10), 8 }
  0x22   : > { %s1218_s11 = sshll.u32 %s1583_s10, 7 }
  0x23   : > { %s227_s12 = ssub.s32 1024, %s1218_s11 }
  0x24   : > { %228 = vsyncadd %s1221_s13, %s227_s12  ;;  %p859_p13 = scmp.ne.s32.totalorder %s1218_s11, 0  ;;  %s893_s15 = sshll.u32 %s1111_s21, 10 }
  0x25   : > { %s1229_s23 = scalar_lea.hbm %s1567_s2, %s893_s15  ;;  %s233_s25 = sshll.u32 %s220_s14, 4  ;;  %s1231_s25 = int_to_ptr.vmem [resolvable:$true] %s233_s25 }
  0x26   : > { %s953_s26 = scalar_lea.hbm %s1229_s23, %s1218_s11  ;;  %s957_s9 = scalar_lea.hbm %s1567_s2, 2560 }
  0x27   : > { %p954_p0 = scmp.ne.s32.totalorder %s1229_s23, %s953_s26  ;;  %p958_p3 = scmp.lt.u32.totalorder %s1229_s23, %s1567_s2 }
  0x28   : > { %p959_p4 = scmp.lt.u32.totalorder %s957_s9, %s953_s26  ;;  %p961_p8 = scmp.lt.u32.totalorder %s953_s26, %s1229_s23 }
  0x29   : > { %p955_p1 = pnand %p954_p0, %p859_p13 }
  0x2a   : > { %p960_p7 = por %p959_p4, %p958_p3 }
  0x2b   : > { %p956_p2 = pneg %p955_p1 }
  0x2c   : > { %p962_p11 = por %p961_p8, %p960_p7 }
  0x2e   : > { %p963_p12 = pnand %p962_p11, %p956_p2 }
  0x30   : > { %966 = shalt.err (!%p963_p12)
}
  0x31   : > { %s967_s14 = scalar_lea.vmem %s1231_s25, %s1218_s11  ;;  %s1113_s15 = smov [#allocation2]  }
  0x32   : > { %p968_p0 = scmp.ne.s32.totalorder %s1231_s25, %s967_s14  ;;  %s971_s16 = sshll.u32 %s1113_s15, 4  ;;  %s972_s16 = int_to_ptr.vmem [resolvable:$false] %s971_s16 }
  0x33   : > { %s973_s17 = scalar_lea.vmem %s972_s16, 2048  ;;  %p974_p9 = scmp.lt.s32.totalorder %s1231_s25, %s972_s16 }
  0x34   : > { %p969_p1 = pnand %p968_p0, %p859_p13  ;;  %p975_p3 = scmp.lt.s32.totalorder %s973_s17, %s967_s14 }
  0x36   : > { %p970_p10 = pneg %p969_p1  ;;  %p976_p4 = por %p975_p3, %p974_p9 }
  0x38   : > { %p977_p7 = pnand %p976_p4, %p970_p10 }
  0x3a   : > { %980 = shalt.err (!%p977_p7)
}
  0x3b   : > { %s1114_s26 = smov 128   ;;  %s1115_s7 = smov 8  }
  0x3c   : > { %239 = dma.hbm_to_vmem [thread:$0]  (%p859_p13), %s1229_s23, %s1218_s11, %s1231_s25, %s1221_s13, %s1114_s26, %s1114_s26, %s1115_s7  }
  0x3d PF: > { %242 = sbr.rel (!%p1196_p5) target bundleno = 96 (0x60), region = 32  ;;  %s243_s8 = sand.u32 (%p1196_p5), 1, %s1107_s20  }
  0x3e   : > { %s864_s9 = sshll.u32 (%p1196_p5), %s1111_s21, 3  ;;  %s863_s10 = sshll.u32 (%p1196_p5), %s243_s8, 6 }
  0x3f   : > { %s249_s12 = ssub.s32 (%p1196_p5), 20, %s864_s9  ;;  %s1265_s16 = scalar_lea.sflag (%p1196_p5), [#allocation6], %s243_s8 }
  0x40   : > { %p250_p9 = scmp.lt.s32.totalorder (%p1196_p5), %s249_s12, 8  ;;  %s247_s11 = scalar_lea.vmem (%p1196_p5), [#allocation5], %s863_s10 }
  0x44   : > { %s1585_s12 = smov (!%p250_p9, %s249_s12), 8 }
  0x45   : > { %s1262_s14 = sshll.u32 %s1585_s12, 7 }
  0x46   : > { %s254_s15 = ssub.s32 1024, %s1262_s14 }
  0x47   : > { %255 = vsyncadd %s1265_s16, %s254_s15  ;;  %p866_p5 = scmp.ne.s32.totalorder %s1262_s14, 0  ;;  %s894_s28 = sshll.u32 %s1111_s21, 10 }
  0x48   : > { %s1273_s25 = scalar_lea.hbm %s1568_s3, %s894_s28  ;;  %s260_s17 = sshll.u32 %s247_s11, 4  ;;  %s1275_s17 = int_to_ptr.vmem [resolvable:$true] %s260_s17 }
  0x49   : > { %s981_s26 = scalar_lea.hbm %s1273_s25, %s1262_s14  ;;  %s985_s9 = scalar_lea.hbm %s1568_s3, 2560 }
  0x4a   : > { %p982_p10 = scmp.ne.s32.totalorder %s1273_s25, %s981_s26  ;;  %p986_p8 = scmp.lt.u32.totalorder %s1273_s25, %s1568_s3 }
  0x4b   : > { %p987_p11 = scmp.lt.u32.totalorder %s985_s9, %s981_s26  ;;  %p989_p0 = scmp.lt.u32.totalorder %s981_s26, %s1273_s25 }
  0x4c   : > { %p983_p13 = pnand %p982_p10, %p866_p5 }
  0x4d   : > { %p988_p12 = por %p987_p11, %p986_p8 }
  0x4e   : > { %p984_p2 = pneg %p983_p13 }
  0x4f   : > { %p990_p1 = por %p989_p0, %p988_p12 }
  0x51   : > { %p991_p3 = pnand %p990_p1, %p984_p2 }
  0x53   : > { %994 = shalt.err (!%p991_p3)
}
  0x54   : > { %s995_s15 = scalar_lea.vmem %s1275_s17, %s1262_s14  ;;  %s1116_s11 = smov [#allocation5]  }
  0x55   : > { %p996_p4 = scmp.ne.s32.totalorder %s1275_s17, %s995_s15  ;;  %s999_s28 = sshll.u32 %s1116_s11, 4  ;;  %s1000_s28 = int_to_ptr.vmem [resolvable:$false] %s999_s28 }
  0x56   : > { %s1001_s13 = scalar_lea.vmem %s1000_s28, 2048  ;;  %p1002_p10 = scmp.lt.s32.totalorder %s1275_s17, %s1000_s28 }
  0x57   : > { %p997_p7 = pnand %p996_p4, %p866_p5  ;;  %p1003_p13 = scmp.lt.s32.totalorder %s1001_s13, %s995_s15 }
  0x59   : > { %p998_p9 = pneg %p997_p7  ;;  %p1004_p8 = por %p1003_p13, %p1002_p10 }
  0x5b   : > { %p1005_p11 = pnand %p1004_p8, %p998_p9 }
  0x5d   : > { %1008 = shalt.err (!%p1005_p11)
}
  0x5e   : > { %s1117_s23 = smov 128   ;;  %s1118_s26 = smov 8  }
  0x5f   : > { %266 = dma.hbm_to_vmem [thread:$0]  (%p866_p5), %s1273_s25, %s1262_s14, %s1275_s17, %s1265_s16, %s1117_s23, %s1117_s23, %s1118_s26  }
  0x60 PF: > { %p870_p2 = scmp.ge.s32.totalorder %s1111_s21, 1  ;;  %p268_p12 = scmp.lt.s32.totalorder %s1111_s21, 4 }
  0x62   : > { %p269_p0 = pnand %p870_p2, %p268_p12 }
  0x63   : > { %s1305_s7 = sand.u32 (!%p269_p0), 1, %s1103_s19  }
  0x64   : > { %272 = sbr.rel (%p269_p0) target bundleno = 324 (0x144), region = 36  ;;  %s1308_s8 = sshll.u32 (!%p269_p0), %s1305_s7, 6 }
  0x65   : > { %s275_s9 = scalar_lea.sflag (!%p269_p0), [#allocation3], %s1305_s7  ;;  %s278_s10 = scalar_lea.vmem (!%p269_p0), [#allocation2], %s1308_s8 }
  0x6b   : > { %1082 = dma.done.wait (%p1200_p6), %s275_s9, 1024  }
  0x6c   : > { %1084 = vsyncadd (%p1200_p6), %s275_s9, 4294966272  ;;  %s284_s14 = scalar_lea.sflag [#allocation6], %s1305_s7  ;;  %s1318_s16 = scalar_lea.vmem [#allocation5], %s1308_s8 }
  0x6d   : > { %1086 = dma.done.wait (%p1200_p6), %s284_s14, 1024  }
  0x6e   : > { %1088 = vsyncadd (%p1200_p6), %s284_s14, 4294966272  ;;  %v1324_v0 = vld [vmem:[%s278_s10 + $0x10] sm:$0xff]  ;;  %v1326_v1 = vld [vmem:[%s278_s10] sm:$0xff]  ;;  %s1119_s25 = smov 64   ;;  %p332_p6 = scmp.lt.s32.totalorder %s1178_s22, 2  ;;  %v366_v18 = vlaneseq }
  0x6f   : > { %474 = vrot.lane.b32.xlu1 %v1324_v0, %s1119_s25  ;;  %470 = vrot.lane.b32.xlu0 %v1326_v1, %s1119_s25  ;;  %v1330_v2 = vld [vmem:[%s278_s10 + $0x18] sm:$0xff]  ;;  %v1332_v3 = vld [vmem:[%s278_s10 + $0x8] sm:$0xff]  ;;  %v1120_v16 = vmov 1966171168   ;;  %s1413_s26 = scalar_lea.vmem [#allocation7], %s1308_s8  ;;  %s1439_s9 = scalar_lea.vmem [#allocation8], %s1308_s8 }
  0x70   : > { %v1336_v4 = vld [vmem:[%s278_s10 + $0x28] sm:$0xff]  ;;  %v1338_v5 = vld [vmem:[%s278_s10 + $0x20] sm:$0xff]  ;;  %v1342_v6 = vld [vmem:[%s278_s10 + $0x38] sm:$0xff]  ;;  %s333_s29 = scalar_select %p332_p6, %s1178_s22, 2  ;;  %v364_v17 = vunpack.c.l.s4 %v1120_v16  ;;  %v367_v20 = vshrl.u32 %v366_v18, 7 }
  0x71   : > { %v1344_v7 = vld [vmem:[%s278_s10 + $0x30] sm:$0xff]  ;;  %v1349_v8 = vld [vmem:[%s1318_s16 + $0x8] sm:$0xff]  ;;  %v1352_v9 = vld [vmem:[%s1318_s16] sm:$0xff]  ;;  %s655_s8 = scalar_lea.sflag [#allocation4], %s1305_s7  ;;  %s660_s10 = scalar_lea.sflag [#allocation9], %s1305_s7 }
  0x72   : > { %v1357_v10 = vld [vmem:[%s1318_s16 + $0x18] sm:$0xff]  ;;  %v1360_v11 = vld [vmem:[%s1318_s16 + $0x10] sm:$0xff]  ;;  %v1365_v12 = vld [vmem:[%s1318_s16 + $0x28] sm:$0xff]  ;;  %s875_s17 = sshll.u32 %s333_s29, 3  ;;  %v365_v19 = vunpack.c.0.s8 %v364_v17  ;;  %v488_v33 = vsub.s32 0, %v367_v20  ;;  %p1575_p5 = scmp.ne.s32.totalorder %s1573_s30, 0 }
  0x73   : > { %476 = vrot.lane.b32.xlu1 %v1330_v2, %s1119_s25  ;;  %472 = vrot.lane.b32.xlu0 %v1332_v3, %s1119_s25  ;;  %v1368_v13 = vld [vmem:[%s1318_s16 + $0x20] sm:$0xff]  ;;  %v1373_v14 = vld [vmem:[%s1318_s16 + $0x38] sm:$0xff]  ;;  %s335_s11 = scalar_lea.vmem %s1565_s0, %s875_s17  ;;  %s339_s23 = scalar_lea.vmem %s1566_s1, %s875_s17 }
  0x74   : > { %v1376_v15 = vld [vmem:[%s1318_s16 + $0x30] sm:$0xff]  ;;  %v368_v21 = vsub.s32 %v365_v19, %v367_v20  ;;  %v360_v22 = vld [vmem:[%s335_s11] sm:$0xff]  ;;  %s879_s14 = sshll.u32 (%p1575_p5), %s1178_s22, 3 }
  0x75   : > { %v411_v23 = vld [vmem:[%s339_s23] sm:$0xff]  ;;  %v362_v26 = vcombine.high %v360_v22, %v360_v22  ;;  %s668_s16 = ssub.s32 (%p1575_p5), 20, %s879_s14 }
  0x76   : > { %v369_v24 = vrot.slane %v360_v22, %v368_v21  ;;  %v420_v25 = vrot.slane %v411_v23, %v368_v21  ;;  %v413_v31 = vcombine.high %v411_v23, %v411_v23  ;;  %p669_p1 = scmp.lt.s32.totalorder (%p1575_p5), %s668_s16, 8 }
  0x77   : > { %480 = vrot.lane.b32.xlu1 %v1336_v4, %s1119_s25  ;;  %478 = vrot.lane.b32.xlu0 %v1338_v5, %s1119_s25  ;;  %v376_v32 = vrot.slane %v362_v26, %v368_v21 }
  0x78   : > { %v385_v27 = vrot.slane %v369_v24, %v368_v21  ;;  %v377_v28 = vcombine.high %v369_v24, %v369_v24  ;;  %v436_v29 = vrot.slane %v420_v25, %v368_v21  ;;  %v428_v30 = vcombine.high %v420_v25, %v420_v25 }
  0x79   : > { %v427_v38 = vrot.slane %v413_v31, %v368_v21  ;;  %v378_v39 = vcombine.high %v376_v32, %v376_v32  ;;  %v392_v49 = vrot.slane %v376_v32, %v368_v21 }
  0x7a   : > { %v407_v34 = vcombine.high %v385_v27, %v385_v27  ;;  %v399_v35 = vrot.slane %v377_v28, %v368_v21  ;;  %v458_v36 = vcombine.high %v436_v29, %v436_v29  ;;  %v450_v37 = vrot.slane %v428_v30, %v368_v21 }
  0x7b   : > { %484 = vrot.lane.b32.xlu1 %v1342_v6, %s1119_s25  ;;  %482 = vrot.lane.b32.xlu0 %v1344_v7, %s1119_s25  ;;  %v1390_v41 = vrot.slane %v385_v27, %v488_v33  ;;  %v1394_v44 = vrot.slane %v436_v29, %v488_v33  ;;  %v429_v46 = vcombine.high %v427_v38, %v427_v38 }
  0x7c   : > { %v1388_v40 = vrot.slane %v407_v34, %v488_v33  ;;  %v409_v42 = vcombine.high %v399_v35, %v399_v35  ;;  %v1392_v43 = vrot.slane %v458_v36, %v488_v33  ;;  %v460_v45 = vcombine.high %v450_v37, %v450_v37 }
  0x7d   : > { %v493_v47 = vrot.slane %v399_v35, %v488_v33  ;;  %v406_v48 = vrot.slane %v378_v39, %v368_v21  ;;  %v526_v51 = vmul.f32 %v1390_v41, %v1326_v1  ;;  %v541_v55 = vrot.slane %v450_v37, %v488_v33 }
  0x7e   : > { %v528_v50 = vmul.f32 %v1388_v40, %v1324_v0  ;;  %v501_v52 = vrot.slane %v409_v42, %v488_v33  ;;  %v443_v56 = vrot.slane %v427_v38, %v368_v21  ;;  %v1402_v59 = vrot.slane %v460_v45, %v488_v33 }
  0x7f   : > { %608 = vrot.lane.b32.xlu1 %v1349_v8, %s1119_s25  ;;  %606 = vrot.lane.b32.xlu0 %v1352_v9, %s1119_s25  ;;  %v457_v60 = vrot.slane %v429_v46, %v368_v21  ;;  %v527_v61 = vmul.f32 %v493_v47, %v1332_v3  ;;  %v1405_v62 = vrot.slane %v406_v48, %v488_v33 }
  0x80   : > { %v1407_v63 = vrot.slane %v392_v49, %v488_v33  ;;  %v408_v0 = vcombine.high %v392_v49, %v392_v49  ;;  %v529_v1 = vmul.f32 %v501_v52, %v1330_v2  ;;  %v410_v16 = vcombine.high %v406_v48, %v406_v48 }
  0x81   : > { %v1410_v22 = vrot.slane %v443_v56, %v488_v33  ;;  %v459_v23 = vcombine.high %v443_v56, %v443_v56  ;;  %v557_v2 = vrot.slane %v457_v60, %v488_v33  ;;  %v461_v24 = vcombine.high %v457_v60, %v457_v60 }
  0x82   : > { %v530_v25 = vmul.f32 %v1407_v63, %v1338_v5  ;;  %v513_v26 = vrot.slane %v408_v0, %v488_v33  ;;  %v531_v27 = vmul.f32 %v1405_v62, %v1336_v4  ;;  %v517_v28 = vrot.slane %v410_v16, %v488_v33 }
  0x83   : > { %612 = vrot.lane.b32.xlu1 %v1357_v10, %s1119_s25  ;;  %610 = vrot.lane.b32.xlu0 %v1360_v11, %s1119_s25  ;;  %v565_v36 = vrot.slane %v461_v24, %v488_v33  ;;  %v561_v37 = vrot.slane %v459_v23, %v488_v33  ;;  %v623_v49 = vmul.f32 %v1349_v8, %v493_v47 }
  0x84   : > { %v533_v5 = vmul.f32 %v517_v28, %v1342_v6  ;;  %v532_v38 = vmul.f32 %v513_v26, %v1344_v7  ;;  %v622_v33 = vmul.f32 %v1352_v9, %v1390_v41  ;;  %v625_v56 = vmul.f32 %v1357_v10, %v501_v52 }
  0x85   : > { %v627_v10 = vmul.f32 %v1365_v12, %v1405_v62 }
  0x87   : > { %616 = vrot.lane.b32.xlu1 %v1365_v12, %s1119_s25  ;;  %614 = vrot.lane.b32.xlu0 %v1368_v13, %s1119_s25  ;;  %v629_v12 = vmul.f32 %v1373_v14, %v517_v28 }
  0x8b   : > { %620 = vrot.lane.b32.xlu1 %v1373_v14, %s1119_s25  ;;  %618 = vrot.lane.b32.xlu0 %v1376_v15, %s1119_s25 }
  0xe1   : > { %v475_v53 = vpop.permute.xlu1 %474  ;;  %v471_v54 = vpop.permute.xlu0 %470 }
  0xe2   : > { %v576_v57 = vmul.f32 %v1392_v43, %v475_v53  ;;  %v574_v58 = vmul.f32 %v1394_v44, %v471_v54 }
  0xe4   : > { %v584_v17 = vadd.f32 %v576_v57, %v528_v50  ;;  %v582_v18 = vadd.f32 %v574_v58, %v526_v51  ;;  %v624_v57 = vmul.f32 %v1360_v11, %v1388_v40  ;;  %v626_v11 = vmul.f32 %v1368_v13, %v1407_v63 }
  0xe5   : > { %v477_v19 = vpop.permute.xlu1 %476  ;;  %v473_v20 = vpop.permute.xlu0 %472 }
  0xe6   : > { %592 = vst [vmem:[%s1413_s26 + $0x10] sm:$0xff] %v584_v17  ;;  %590 = vst [vmem:[%s1413_s26] sm:$0xff] %v582_v18  ;;  %v577_v3 = vmul.f32 %v1402_v59, %v477_v19  ;;  %v575_v21 = vmul.f32 %v541_v55, %v473_v20 }
  0xe8   : > { %v585_v29 = vadd.f32 %v577_v3, %v529_v1  ;;  %v583_v30 = vadd.f32 %v575_v21, %v527_v61 }
  0xe9   : > { %v481_v31 = vpop.permute.xlu1 %480  ;;  %v479_v32 = vpop.permute.xlu0 %478 }
  0xea   : > { %593 = vst [vmem:[%s1413_s26 + $0x18] sm:$0xff] %v585_v29  ;;  %591 = vst [vmem:[%s1413_s26 + $0x8] sm:$0xff] %v583_v30  ;;  %v579_v34 = vmul.f32 %v557_v2, %v481_v31  ;;  %v578_v35 = vmul.f32 %v1410_v22, %v479_v32 }
  0xec   : > { %v587_v4 = vadd.f32 %v579_v34, %v531_v27  ;;  %v586_v39 = vadd.f32 %v578_v35, %v530_v25 }
  0xed   : > { %v485_v42 = vpop.permute.xlu1 %484  ;;  %v483_v45 = vpop.permute.xlu0 %482 }
  0xee   : > { %595 = vst [vmem:[%s1413_s26 + $0x28] sm:$0xff] %v587_v4  ;;  %594 = vst [vmem:[%s1413_s26 + $0x20] sm:$0xff] %v586_v39  ;;  %v581_v46 = vmul.f32 %v565_v36, %v485_v42  ;;  %v580_v48 = vmul.f32 %v561_v37, %v483_v45 }
  0xf0   : > { %v589_v50 = vadd.f32 %v581_v46, %v533_v5  ;;  %v588_v6 = vadd.f32 %v580_v48, %v532_v38 }
  0xf1   : > { %v609_v51 = vpop.permute.xlu1 %608  ;;  %v607_v53 = vpop.permute.xlu0 %606 }
  0xf2   : > { %597 = vst [vmem:[%s1413_s26 + $0x38] sm:$0xff] %v589_v50  ;;  %596 = vst [vmem:[%s1413_s26 + $0x30] sm:$0xff] %v588_v6  ;;  %v631_v7 = vmul.f32 %v609_v51, %v541_v55  ;;  %v630_v54 = vmul.f32 %v607_v53, %v1394_v44 }
  0xf4   : > { %v639_v58 = vadd.f32 %v631_v7, %v623_v49  ;;  %v638_v8 = vadd.f32 %v630_v54, %v622_v33 }
  0xf5   : > { %v613_v47 = vpop.permute.xlu1 %612  ;;  %v611_v60 = vpop.permute.xlu0 %610 }
  0xf6   : > { %647 = vst [vmem:[%s1439_s9 + $0x8] sm:$0xff] %v639_v58  ;;  %646 = vst [vmem:[%s1439_s9] sm:$0xff] %v638_v8  ;;  %v633_v9 = vmul.f32 %v613_v47, %v1402_v59  ;;  %v632_v41 = vmul.f32 %v611_v60, %v1392_v43  ;;  %v628_v59 = vmul.f32 %v1376_v15, %v513_v26 }
  0xf8   : > { %v641_v40 = vadd.f32 %v633_v9, %v625_v56  ;;  %v640_v44 = vadd.f32 %v632_v41, %v624_v57 }
  0xf9   : > { %v617_v52 = vpop.permute.xlu1 %616  ;;  %v615_v55 = vpop.permute.xlu0 %614 }
  0xfa   : > { %649 = vst [vmem:[%s1439_s9 + $0x18] sm:$0xff] %v641_v40  ;;  %648 = vst [vmem:[%s1439_s9 + $0x10] sm:$0xff] %v640_v44  ;;  %v635_v61 = vmul.f32 %v617_v52, %v557_v2  ;;  %v634_v43 = vmul.f32 %v615_v55, %v1410_v22 }
  0xfc   : > { %v643_v62 = vadd.f32 %v635_v61, %v627_v10  ;;  %v642_v13 = vadd.f32 %v634_v43, %v626_v11  ;;  %666 = sbr.rel (!%p1575_p5) target bundleno = 287 (0x11f), region = 48 }
  0xfd   : > { %v621_v63 = vpop.permute.xlu1 %620  ;;  %v619_v0 = vpop.permute.xlu0 %618 }
  0xfe   : > { %651 = vst [vmem:[%s1439_s9 + $0x28] sm:$0xff] %v643_v62  ;;  %650 = vst [vmem:[%s1439_s9 + $0x20] sm:$0xff] %v642_v13  ;;  %v637_v1 = vmul.f32 %v621_v63, %v565_v36  ;;  %v636_v16 = vmul.f32 %v619_v0, %v561_v37 }
 0x100   : > { %v645_v17 = vadd.f32 %v637_v1, %v629_v12  ;;  %v644_v18 = vadd.f32 %v636_v16, %v628_v59 }
 0x102   : > { %653 = vst [vmem:[%s1439_s9 + $0x38] sm:$0xff] %v645_v17  ;;  %652 = vst [vmem:[%s1439_s9 + $0x30] sm:$0xff] %v644_v18 }
 0x103   : > { %s1587_s16 = smov (!%p669_p1, %s668_s16), 8 }
 0x104   : > { %s1463_s25 = sshll.u32 %s1587_s16, 7 }
 0x105   : > { %s673_s29 = ssub.s32 1024, %s1463_s25 }
 0x106   : > { %674 = vsyncadd %s655_s8, %s673_s29  ;;  %p881_p3 = scmp.ne.s32.totalorder %s1463_s25, 0  ;;  %s895_s17 = sshll.u32 %s1178_s22, 10 }
 0x107   : > { %s1473_s11 = scalar_lea.hbm %s1569_s4, %s895_s17  ;;  %s679_s28 = sshll.u32 %s1413_s26, 4  ;;  %s1476_s28 = int_to_ptr.vmem [resolvable:$true] %s679_s28 }
 0x108   : > { %s1009_s13 = scalar_lea.vmem %s1476_s28, %s1463_s25  ;;  %s1121_s23 = smov [#allocation7]  }
 0x109   : > { %p1010_p4 = scmp.ne.s32.totalorder %s1476_s28, %s1009_s13  ;;  %s1013_s14 = sshll.u32 %s1121_s23, 4  ;;  %s1014_s14 = int_to_ptr.vmem [resolvable:$false] %s1013_s14 }
 0x10a   : > { %s1015_s16 = scalar_lea.vmem %s1014_s14, 2048  ;;  %p1016_p10 = scmp.lt.s32.totalorder %s1476_s28, %s1014_s14 }
 0x10b   : > { %p1011_p7 = pnand %p1010_p4, %p881_p3  ;;  %p1017_p13 = scmp.lt.s32.totalorder %s1015_s16, %s1009_s13 }
 0x10d   : > { %p1012_p9 = pneg %p1011_p7  ;;  %p1018_p8 = por %p1017_p13, %p1016_p10 }
 0x10f   : > { %p1019_p11 = pnand %p1018_p8, %p1012_p9 }
 0x111   : > { %1022 = shalt.err (!%p1019_p11)
}
 0x112   : > { %s1023_s26 = scalar_lea.hbm %s1473_s11, %s1463_s25  ;;  %s1027_s12 = scalar_lea.hbm %s1569_s4, 2560 }
 0x113   : > { %p1024_p2 = scmp.ne.s32.totalorder %s1473_s11, %s1023_s26  ;;  %p1028_p6 = scmp.lt.u32.totalorder %s1473_s11, %s1569_s4 }
 0x114   : > { %p1029_p5 = scmp.lt.u32.totalorder %s1027_s12, %s1023_s26  ;;  %p1031_p4 = scmp.lt.u32.totalorder %s1023_s26, %s1473_s11 }
 0x115   : > { %p1025_p12 = pnand %p1024_p2, %p881_p3 }
 0x116   : > { %p1030_p1 = por %p1029_p5, %p1028_p6 }
 0x117   : > { %p1026_p0 = pneg %p1025_p12 }
 0x118   : > { %p1032_p7 = por %p1031_p4, %p1030_p1 }
 0x11a   : > { %p1033_p9 = pnand %p1032_p7, %p1026_p0 }
 0x11c   : > { %1036 = shalt.err (!%p1033_p9)
}
 0x11d   : > { %s1122_s23 = smov 128   ;;  %s1123_s14 = smov 8  }
 0x11e   : > { %685 = dma.vmem_to_hbm [thread:$0]  (%p881_p3), %s1476_s28, %s1463_s25, %s1473_s11, %s655_s8, %s1122_s23, %s1122_s23, %s1123_s14  }
 0x11f PF: > { %p1576_p10 = scmp.ne.s32.totalorder %s1573_s30, 0 }
 0x120   : > { %s885_s16 = sshll.u32 (%p1576_p10), %s1178_s22, 3 }
 0x121   : > { %688 = sbr.rel (!%p1576_p10) target bundleno = 324 (0x144), region = 52  ;;  %s690_s26 = ssub.s32 (%p1576_p10), 20, %s885_s16 }
 0x122   : > { %p691_p13 = scmp.lt.s32.totalorder (%p1576_p10), %s690_s26, 8 }
 0x128   : > { %s1589_s26 = smov (!%p691_p13, %s690_s26), 8 }
 0x129   : > { %s1507_s29 = sshll.u32 %s1589_s26, 7 }
 0x12a   : > { %s695_s17 = ssub.s32 1024, %s1507_s29 }
 0x12b   : > { %696 = vsyncadd %s660_s10, %s695_s17  ;;  %p887_p3 = scmp.ne.s32.totalorder %s1507_s29, 0  ;;  %s896_s30 = sshll.u32 %s1178_s22, 10 }
 0x12c   : > { %s1517_s11 = scalar_lea.hbm %s1570_s5, %s896_s30  ;;  %s701_s28 = sshll.u32 %s1439_s9, 4  ;;  %s1520_s28 = int_to_ptr.vmem [resolvable:$true] %s701_s28 }
 0x12d   : > { %s1037_s12 = scalar_lea.vmem %s1520_s28, %s1507_s29  ;;  %s1124_s15 = smov [#allocation8]  }
 0x12e   : > { %p1038_p8 = scmp.ne.s32.totalorder %s1520_s28, %s1037_s12  ;;  %s1041_s13 = sshll.u32 %s1124_s15, 4  ;;  %s1042_s13 = int_to_ptr.vmem [resolvable:$false] %s1041_s13 }
 0x12f   : > { %s1043_s22 = scalar_lea.vmem %s1042_s13, 2048  ;;  %p1044_p12 = scmp.lt.s32.totalorder %s1520_s28, %s1042_s13 }
 0x130   : > { %p1039_p11 = pnand %p1038_p8, %p887_p3  ;;  %p1045_p0 = scmp.lt.s32.totalorder %s1043_s22, %s1037_s12 }
 0x132   : > { %p1040_p2 = pneg %p1039_p11  ;;  %p1046_p6 = por %p1045_p0, %p1044_p12 }
 0x134   : > { %p1047_p5 = pnand %p1046_p6, %p1040_p2 }
 0x136   : > { %1050 = shalt.err (!%p1047_p5)
}
 0x137   : > { %s1051_s9 = scalar_lea.hbm %s1517_s11, %s1507_s29  ;;  %s1055_s16 = scalar_lea.hbm %s1570_s5, 2560 }
 0x138   : > { %p1052_p1 = scmp.ne.s32.totalorder %s1517_s11, %s1051_s9  ;;  %p1056_p9 = scmp.lt.u32.totalorder %s1517_s11, %s1570_s5 }
 0x139   : > { %p1057_p10 = scmp.lt.u32.totalorder %s1055_s16, %s1051_s9  ;;  %p1059_p8 = scmp.lt.u32.totalorder %s1051_s9, %s1517_s11 }
 0x13a   : > { %p1053_p4 = pnand %p1052_p1, %p887_p3 }
 0x13b   : > { %p1058_p13 = por %p1057_p10, %p1056_p9 }
 0x13c   : > { %p1054_p7 = pneg %p1053_p4 }
 0x13d   : > { %p1060_p11 = por %p1059_p8, %p1058_p13 }
 0x13f   : > { %p1061_p2 = pnand %p1060_p11, %p1054_p7 }
 0x141   : > { %1064 = shalt.err (!%p1061_p2)
}
 0x142   : > { %s1125_s30 = smov 128   ;;  %s1126_s8 = smov 8  }
 0x143   : > { %707 = dma.vmem_to_hbm [thread:$0]  (%p887_p3), %s1520_s28, %s1507_s29, %s1517_s11, %s660_s10, %s1125_s30, %s1125_s30, %s1126_s8  }
 0x144 PF: > { %p908_p12 = scmp.ge.s32.totalorder %s1111_s21, 2  ;;  %s716_s25 = sand.u32 1, %s1099_s18  }
 0x145   : > { %p1577_p0 = scmp.ne.s32.totalorder %s1574_s6, 0  ;;  %s717_s12 = scalar_lea.sflag [#allocation4], %s716_s25 }
 0x147   : > { %p902_p6 = pnand %p908_p12, %p1577_p0 }
 0x149   : > { %1090 = dma.done.wait (!%p902_p6), %s717_s12, 1024  }
 0x14a   : > { %1092 = vsyncadd (!%p902_p6), %s717_s12, 4294966272  ;;  %s726_s15 = scalar_lea.sflag [#allocation9], %s716_s25 }
 0x14b   : > { %1094 = dma.done.wait (!%p902_p6), %s726_s15, 1024  }
 0x14c   : > { %1096 = vsyncadd (!%p902_p6), %s726_s15, 4294966272  ;;  %p25_p3 = scmp.ge.s32.totalorder %s1182_s24, 5   ;;  %s1578_s18 = smov %s1103_s19 }
 0x14d   : > { %s1579_s19 = smov %s1107_s20  ;;  %s1580_s20 = smov %s1194_s27 }
 0x14e   : > { %s1581_s21 = smov %s1182_s24  ;;  %27 = sbr.rel (!%p25_p3) target bundleno = 9 (0x9), region = 117 }
 0x155   :  { %731 = vsyncpa [#allocation3], 1 }
 0x156   :  { %733 = vsyncpa [#allocation3 + $0x1], 1 }
 0x157   :  { %734 = vsyncpa [#allocation6], 1 }
 0x158   :  { %736 = vsyncpa [#allocation6 + $0x1], 1 }
 0x159   :  { %737 = vsyncpa [#allocation4], 1 }
 0x15a   :  { %739 = vsyncpa [#allocation4 + $0x1], 1 }
 0x15b   :  { %740 = vsyncpa [#allocation9], 1 }
 0x15c   :  { %742 = vsyncpa [#allocation9 + $0x1], 1 }

</bundles_post_ra>
